<compile_context>
chip_gen: v7x
topology: tpu7x:2x2x1
jax: 0.10.0
libtpu: 0.0.40
codegen_flags: <defaults>
</compile_context>

<pallas_src>
import jax
import jax.numpy as jnp
from jax.experimental import pallas as pl
from jax.experimental.pallas import tpu as pltpu


def _encoder_kernel(ids_ref, table_ref, wt_ref, b_ref, o_ref):
    # ids_ref:   (B*L, 1) int32  flattened token ids
    # table_ref: (V, H)    f32   embedding table (row 0 zeroed == padding_idx=0)
    # wt_ref:    (H, H)    f32   pre-transposed Linear weight: (H_in, H_out)
    # b_ref:     (1, H)    f32   Linear bias
    # o_ref:     (B, H)    f32   max-pooled sentence encodings
    V, H = table_ref.shape
    B = o_ref.shape[0]
    BL = ids_ref.shape[0]
    L = BL // B

    # Fold embedding + Linear: proj[v, k] = sum_h table[v, h] * W[k, h].
    # Computed once per call, shared by every batch row / sequence position.
    proj = jax.lax.dot_general(
        table_ref[...], wt_ref[...],
        dimension_numbers=(((1,), (0,)), ((), ())),
        preferred_element_type=jnp.float32,
        precision=jax.lax.Precision.HIGHEST,
    )                                                            # (V, H)

    # MXU-native one-hot gather: onehot[(b,l), v] = (ids[(b,l)] == v).
    ids = ids_ref[...]                                           # (B*L, 1) int32
    iota_v = jax.lax.broadcasted_iota(jnp.int32, (BL, V), 1)     # iota_v[r, v] = v
    onehot = (iota_v == ids).astype(jnp.float32)                 # (B*L, V)

    y = jax.lax.dot_general(
        onehot, proj,
        dimension_numbers=(((1,), (0,)), ((), ())),
        preferred_element_type=jnp.float32,
        precision=jax.lax.Precision.HIGHEST,
    )                                                            # (B*L, H)

    # max_pool1d over the full sequence == max over L; bias is L-invariant so add after.
    pooled = jnp.max(y.reshape(B, L, H), axis=1) + b_ref[...]    # (B, H)
    o_ref[...] = pooled.astype(o_ref.dtype)


def sentence_encoder_forward(token_ids, emb_table, weight, bias):
    """token_ids: (B, L) int32; emb_table: (V, H) f32 (row 0 zeroed for padding_idx=0);
    weight: (H, H) torch-style (out, in); bias: (H,). Returns (B, H) float32."""
    B, L = token_ids.shape
    V, H = emb_table.shape

    ids2 = token_ids.reshape(B * L, 1).astype(jnp.int32)         # flatten once in wrapper
    w_t = jnp.transpose(weight).astype(jnp.float32)              # one-time (H_in, H_out)
    b2 = bias.reshape(1, H).astype(jnp.float32)

    cost = pl.CostEstimate(
        flops=2 * V * H * H + 2 * B * L * V * H,
        transcendentals=0,
        bytes_accessed=V * H * 4 + H * H * 4 + B * L * 4 + H * 4 + B * H * 4,
    )

    out = pl.pallas_call(
        _encoder_kernel,
        out_shape=jax.ShapeDtypeStruct((B, H), jnp.float32),
        grid_spec=pltpu.PrefetchScalarGridSpec(
            num_scalar_prefetch=0,
            grid=(1,),                                           # whole batch in one step
            in_specs=[
                pl.BlockSpec((B * L, 1), lambda i: (0, 0)),      # flattened token ids
                pl.BlockSpec((V, H), lambda i: (0, 0)),          # full embedding table (6.4 KB)
                pl.BlockSpec((H, H), lambda i: (0, 0)),          # pre-transposed weight
                pl.BlockSpec((1, H), lambda i: (0, 0)),          # bias
            ],
            out_specs=pl.BlockSpec((B, H), lambda i: (0, 0)),    # one sublane-dense store
        ),
        compiler_params=pltpu.CompilerParams(
            dimension_semantics=("arbitrary",),
        ),
        cost_estimate=cost,
    )(ids2, emb_table.astype(jnp.float32), w_t, b2)
    return out


def _reference(token_ids, emb_table, weight, bias):
    emb = jnp.take(emb_table, token_ids, axis=0).astype(jnp.float32)     # (B, L, H)
    y = jnp.einsum(
        "blh,kh->blk", emb, weight.astype(jnp.float32),
        precision=jax.lax.Precision.HIGHEST,
    ) + bias
    return jnp.max(y, axis=1)                                            # (B, H)


if __name__ == "__main__":
    # config: hidden_size=32, vocab_size=49 (+1 for pad = 50), max_length=8, batch=2
    HIDDEN = 32
    VOCAB = 49 + 1
    MAX_LEN = 8
    BATCH = 2

    key = jax.random.PRNGKey(0)
    k_emb, k_w, k_b, k_tok = jax.random.split(key, 4)

    # nn.Embedding(vocab_size+1, hidden_size, padding_idx=0): N(0,1) init, row 0 zeroed.
    emb_table = jax.random.normal(k_emb, (VOCAB, HIDDEN), dtype=jnp.float32)
    emb_table = emb_table.at[0].set(0.0)

    # nn.Linear(hidden, hidden): uniform(-1/sqrt(H), 1/sqrt(H)) for weight/bias.
    bound = 1.0 / (HIDDEN ** 0.5)
    weight = jax.random.uniform(k_w, (HIDDEN, HIDDEN), jnp.float32, -bound, bound)
    bias = jax.random.uniform(k_b, (HIDDEN,), jnp.float32, -bound, bound)

    # Token ids, including some trailing padding zeros.
    token_ids = jax.random.randint(k_tok, (BATCH, MAX_LEN), 0, VOCAB, dtype=jnp.int32)
    token_ids = token_ids.at[:, -2:].set(0)

    fwd = jax.jit(sentence_encoder_forward)
    out = fwd(token_ids, emb_table, weight, bias)
    out = jax.block_until_ready(out)

    ref = _reference(token_ids, emb_table, weight, bias)
    assert out.shape == (BATCH, HIDDEN), out.shape
    assert jnp.allclose(out, ref, atol=1e-5, rtol=1e-5), (
        float(jnp.max(jnp.abs(out - ref)))
    )
    # TODO(synk): PyTorch's .squeeze() would also drop the batch dim when B == 1; we keep (B, H).
    # Note: self.dropout is defined but never used in the reference forward, so it is omitted.
    print("KERNEL_OK")
</pallas_src>

<mosaic_0001>
module attributes {stable_mosaic.version = 11 : i64} {
  func.func @_encoder_kernel(%arg0: i32, %arg1: memref<16x1xi32, #tpu.memory_space<vmem>>, %arg2: memref<50x32xf32, #tpu.memory_space<vmem>>, %arg3: memref<32x32xf32, #tpu.memory_space<vmem>>, %arg4: memref<1x32xf32, #tpu.memory_space<vmem>>, %arg5: memref<2x32xf32, #tpu.memory_space<vmem>>) attributes {dimension_semantics = [#tpu.dimension_semantics<arbitrary>], iteration_bounds = array<i64: 1>, scalar_prefetch = 0 : i64, scratch_operands = 0 : i64, tpu.core_type = #tpu.core_type<tc>, window_params = [{pipeline_mode = #tpu.pipeline_mode<synchronous>, transform_indices = @transform_0, window_bounds = array<i64: 16, 1>}, {pipeline_mode = #tpu.pipeline_mode<synchronous>, transform_indices = @transform_1, window_bounds = array<i64: 50, 32>}, {pipeline_mode = #tpu.pipeline_mode<synchronous>, transform_indices = @transform_2, window_bounds = array<i64: 32, 32>}, {pipeline_mode = #tpu.pipeline_mode<synchronous>, transform_indices = @transform_3, window_bounds = array<i64: 1, 32>}, {pipeline_mode = #tpu.pipeline_mode<synchronous>, transform_indices = @transform_4, window_bounds = array<i64: 2, 32>}]} {
    %c0 = arith.constant 0 : index
    %c0_0 = arith.constant 0 : index
    %0 = vector.load %arg2[%c0, %c0_0] : memref<50x32xf32, #tpu.memory_space<vmem>>, vector<50x32xf32>
    %c0_1 = arith.constant 0 : index
    %c0_2 = arith.constant 0 : index
    %1 = vector.load %arg3[%c0_1, %c0_2] : memref<32x32xf32, #tpu.memory_space<vmem>>, vector<32x32xf32>
    %cst = arith.constant dense<0.000000e+00> : vector<50x32xf32>
    %2 = tpu.matmul %0, %1, %cst {dimension_numbers = #tpu.dot_dimension_numbers<[1], [0], [0], [1], [0, 0, 1, 1], [], []>, precision = #tpu.contract_precision<fp32>} : vector<50x32xf32>, vector<32x32xf32>, vector<50x32xf32> -> vector<50x32xf32>
    %c0_3 = arith.constant 0 : index
    %c0_4 = arith.constant 0 : index
    %3 = vector.load %arg1[%c0_3, %c0_4] : memref<16x1xi32, #tpu.memory_space<vmem>>, vector<16x1xi32>
    %4 = tpu.iota {dimensions = array<i32: 1>} : vector<16x50xi32>
    %5 = vector.broadcast %3 : vector<16x1xi32> to vector<16x50xi32>
    %6 = arith.cmpi eq, %4, %5 : vector<16x50xi32>
    %7 = arith.extui %6 : vector<16x50xi1> to vector<16x50xi32>
    %8 = arith.sitofp %7 : vector<16x50xi32> to vector<16x50xf32>
    %cst_5 = arith.constant dense<0.000000e+00> : vector<16x32xf32>
    %9 = tpu.matmul %8, %2, %cst_5 {dimension_numbers = #tpu.dot_dimension_numbers<[1], [0], [0], [1], [0, 0, 1, 1], [], []>, precision = #tpu.contract_precision<fp32>} : vector<16x50xf32>, vector<50x32xf32>, vector<16x32xf32> -> vector<16x32xf32>
    %10 = vector.shape_cast %9 : vector<16x32xf32> to vector<2x8x32xf32>
    %cst_6 = arith.constant dense<0xFF800000> : vector<2x32xf32>
    %11 = vector.multi_reduction <maximumf>, %10, %cst_6 [1] : vector<2x8x32xf32> to vector<2x32xf32>
    %c0_7 = arith.constant 0 : index
    %c0_8 = arith.constant 0 : index
    %12 = vector.load %arg4[%c0_7, %c0_8] : memref<1x32xf32, #tpu.memory_space<vmem>>, vector<1x32xf32>
    %13 = vector.broadcast %12 : vector<1x32xf32> to vector<2x32xf32>
    %14 = arith.addf %11, %13 : vector<2x32xf32>
    %c0_9 = arith.constant 0 : index
    %c0_10 = arith.constant 0 : index
    %15 = vector.load %arg5[%c0_9, %c0_10] : memref<2x32xf32, #tpu.memory_space<vmem>>, vector<2x32xf32>
    tpu.vector_store %arg5[%c0_9, %c0_10], %14 {strides = array<i32>} : memref<2x32xf32, #tpu.memory_space<vmem>>, vector<2x32xf32>,
    return
  }
  func.func @transform_0(%arg0: i32) -> (i32, i32) {
    %c0_i32 = arith.constant 0 : i32
    %c0_i32_0 = arith.constant 0 : i32
    %c0_i32_1 = arith.constant 0 : i32
    return %c0_i32, %c0_i32_0 : i32, i32
  }
  func.func @transform_1(%arg0: i32) -> (i32, i32) {
    %c0_i32 = arith.constant 0 : i32
    %c0_i32_0 = arith.constant 0 : i32
    %c0_i32_1 = arith.constant 0 : i32
    return %c0_i32, %c0_i32_0 : i32, i32
  }
  func.func @transform_2(%arg0: i32) -> (i32, i32) {
    %c0_i32 = arith.constant 0 : i32
    %c0_i32_0 = arith.constant 0 : i32
    %c0_i32_1 = arith.constant 0 : i32
    return %c0_i32, %c0_i32_0 : i32, i32
  }
  func.func @transform_3(%arg0: i32) -> (i32, i32) {
    %c0_i32 = arith.constant 0 : i32
    %c0_i32_0 = arith.constant 0 : i32
    %c0_i32_1 = arith.constant 0 : i32
    return %c0_i32, %c0_i32_0 : i32, i32
  }
  func.func @transform_4(%arg0: i32) -> (i32, i32) {
    %c0_i32 = arith.constant 0 : i32
    %c0_i32_0 = arith.constant 0 : i32
    %c0_i32_1 = arith.constant 0 : i32
    return %c0_i32, %c0_i32_0 : i32, i32
  }
}

</mosaic_0001>

<bundles_post_ra>
// kernel: sentence_encoder_forward.1
= control target key start
LH: loop header
LB: loop body
LE: loop exit
PB: predicated region body
PF: predicated region fallthrough
CT: control target
= control target key end

     0   :  { %v2053_v3 = vmov 0.0|0.0   ;;  %vm2054_vm0 = vmmov 0   ;;  %v2055_v8 = vmov 0.0   ;;  %vm29_vm1 = vcmask 261120   ;;  %s2457_s0 = inlined_call_operand.vmem [shape: s32[16,1], index: 0, kind: input, shape index: {}]   ;;  %s2458_s1 = inlined_call_operand.vmem [shape: f32[50,32], index: 1, kind: input, shape index: {}]   ;;  %s2459_s2 = inlined_call_operand.vmem [shape: f32[32,32], index: 2, kind: input, shape index: {}]   ;;  %s2460_s3 = inlined_call_operand.vmem [shape: f32[1,32], index: 3, kind: input, shape index: {}]   ;;  %s2461_s4 = inlined_call_operand.hbm [shape: f32[2,32], index: 4, kind: output, shape index: {}]  }
   0x1   :  { %v25_v0 = vld [vmem:[%s2459_s2] sm:$0xff]  ;;  %v26_v1 = vld [vmem:[%s2459_s2 + $0x8] sm:$0xff]  ;;  %v27_v2 = vld [vmem:[%s2459_s2 + $0x10] sm:$0xff]  ;;  %1844 = vmatprep.subr.bf16.mxu0 %v2053_v3  ;;  %1599 = vmatprep.mubr.msk.f32.mxu0 %vm2054_vm0, %v2055_v8 }
   0x2   :  { %v52_v4 = vand.u32 4294901760, %v25_v0  ;;  %v55_v5 = vand.u32 4294901760, %v26_v1  ;;  %v28_v6 = vld [vmem:[%s2459_s2 + $0x18] sm:$0xff]  ;;  %v58_v7 = vand.u32 4294901760, %v27_v2  ;;  %v18_v10 = vld [vmem:[%s2458_s1] sm:$0xff]  ;;  %1838 = vmatprep.subr.bf16.mxu1 %v2053_v3  ;;  %1570 = vmatprep.mubr.msk.f32.mxu1 %vm2054_vm0, %v2055_v8  ;;  %v19_v14 = vld [vmem:[%s2458_s1 + $0x8] sm:$0xff] }
   0x3   :  { %v61_v9 = vand.u32 4294901760, %v28_v6  ;;  %v20_v17 = vld [vmem:[%s2458_s1 + $0x10] sm:$0xff] }
   0x4   :  { %v2104_v11 = vsub.f32 %v25_v0, %v52_v4  ;;  %v2106_v12 = vsub.f32 %v26_v1, %v55_v5  ;;  %v2108_v13 = vsub.f32 %v27_v2, %v58_v7  ;;  %v2115_v16 = vpack.c.bf16 %v55_v5, %v52_v4 }
   0x5   :  { %v2113_v15 = vsub.f32 %v28_v6, %v61_v9 }
   0x6   :  { %9 = vsyncpa [#allocation3], 0  ;;  %v193_v18 = vand.u32 4294901760, %v2104_v11  ;;  %v200_v19 = vand.u32 4294901760, %v2106_v12  ;;  %v207_v20 = vand.u32 4294901760, %v2108_v13  ;;  %v31_v21 = vsel %vm29_vm1, %v18_v10, 0  ;;  %1840 = vmatpush3.bf16.msra.mxu1 %v2115_v16 }
   0x7   :  { %v214_v22 = vand.u32 4294901760, %v2113_v15  ;;  %v34_v23 = vsel %vm29_vm1, %v19_v14, 0  ;;  %v37_v27 = vsel %vm29_vm1, %v20_v17, 0  ;;  %1841 = vmatprep.subr.bf16.mxu1 %v2053_v3  ;;  %v2141_v29 = vand.u32 4294901760, %v31_v21  ;;  %v21_v30 = vld [vmem:[%s2458_s1 + $0x18] sm:$0xff]  ;;  %v22_v42 = vld [vmem:[%s2458_s1 + $0x20] sm:$0xff] }
   0x8   :  { %v194_v24 = vsub.f32 %v2104_v11, %v193_v18  ;;  %v201_v25 = vsub.f32 %v2106_v12, %v200_v19  ;;  %v208_v26 = vsub.f32 %v2108_v13, %v207_v20  ;;  %v2146_v34 = vand.u32 4294901760, %v34_v23  ;;  %v23_v51 = vld [vmem:[%s2458_s1 + $0x28] sm:$0xff]  ;;  %v24_v60 = vld [vmem:[%s2458_s1 + $0x30] sm:$0x3]  ;;  %s2057_s14 = smov [#allocation2]  }
   0x9   :  { %v215_v28 = vsub.f32 %v2113_v15, %v214_v22  ;;  %v2149_v36 = vsub.f32 %v31_v21, %v2141_v29  ;;  %v2151_v37 = vand.u32 4294901760, %v37_v27  ;;  %v2153_v38 = vpack.c.bf16 %v61_v9, %v58_v7  ;;  %v794_v7 = vld [vmem:[%s2457_s0] sm:$0xff]  ;;  %s1425_s15 = sshll.u32 %s2057_s14, 4  ;;  %s1426_s15 = int_to_ptr.vmem [resolvable:$true] %s1425_s15 }
   0xa   :  { %v195_v31 = vand.u32 4294901760, %v194_v24  ;;  %v202_v32 = vand.u32 4294901760, %v201_v25  ;;  %v209_v33 = vand.u32 4294901760, %v208_v26  ;;  %v2156_v40 = vsub.f32 %v34_v23, %v2146_v34  ;;  %v795_v23 = vld [vmem:[%s2457_s0 + $0x8] sm:$0xff]  ;;  %s2029_s16 = scalar_lea.vmem %s1426_s15, 32  ;;  %p2034_p1 = scmp.lt.s32.totalorder %s1426_s15, %s1426_s15 }
   0xb   :  { %v216_v35 = vand.u32 4294901760, %v215_v28  ;;  %v40_v41 = vsel %vm29_vm1, %v21_v30, 0  ;;  %v122_v43 = vand.u32 4294901760, %v2149_v36  ;;  %1843 = vmatpush3.bf16.msra.mxu1 %v2153_v38  ;;  %v2168_v46 = vsub.f32 %v37_v27, %v2151_v37  ;;  %p2030_p0 = scmp.ne.s32.totalorder %s1426_s15, %s2029_s16  ;;  %p2035_p2 = scmp.lt.s32.totalorder %s2029_s16, %s2029_s16 }
   0xc   :  { %v1845_v39 = vpack.c.bf16 %v202_v32, %v195_v31  ;;  %v132_v45 = vand.u32 4294901760, %v2156_v40  ;;  %1946 = vmatprep.subr.bf16.mxu1 %v2053_v3  ;;  %v2170_v47 = vand.u32 4294901760, %v40_v41  ;;  %v43_v49 = vsel %vm29_vm1, %v22_v42, 0 }
   0xd   :  { %v1848_v44 = vpack.c.bf16 %v216_v35, %v209_v33  ;;  %v123_v48 = vsub.f32 %v2149_v36, %v122_v43  ;;  %v142_v52 = vand.u32 4294901760, %v2168_v46  ;;  %v1851_v54 = vpack.c.bf16 %v2106_v12, %v2104_v11  ;;  %p2036_p3 = por %p2035_p2, %p2034_p1 }
   0xe   :  { %1846 = vmatpush3.bf16.msra.mxu0 %v1845_v39  ;;  %v133_v50 = vsub.f32 %v2156_v40, %v132_v45  ;;  %v2187_v55 = vsub.f32 %v40_v41, %v2170_v47  ;;  %v2189_v56 = vand.u32 4294901760, %v43_v49  ;;  %v46_v59 = vsel %vm29_vm1, %v23_v51, 0 }
   0xf   :  { %1847 = vmatprep.subr.bf16.mxu0 %v2053_v3  ;;  %v124_v53 = vand.u32 4294901760, %v123_v48  ;;  %v143_v58 = vsub.f32 %v2168_v46, %v142_v52  ;;  %v1854_v62 = vpack.c.bf16 %v2113_v15, %v2108_v13  ;;  %v2211_v0 = vand.u32 4294901760, %v46_v59  ;;  %p2037_p4 = pnand %p2036_p3, %p2030_p0 }
  0x10   :  { %v134_v57 = vand.u32 4294901760, %v133_v50  ;;  %v152_v61 = vand.u32 4294901760, %v2187_v55  ;;  %v2209_v63 = vsub.f32 %v43_v49, %v2189_v56  ;;  %v49_v4 = vsel %vm29_vm1, %v24_v60, 0 }
  0x11   :  { %1571 = vmatmul.mubr.f32.vlgmr.msra.gmra.mrb[0].mxu1 %v124_v53  ;;  %v144_v1 = vand.u32 4294901760, %v143_v58  ;;  %v2056_v6 = vmov 0   ;;  %v2228_v9 = vsub.f32 %v46_v59, %v2211_v0  ;;  %v2230_v10 = vand.u32 4294901760, %v49_v4 }
  0x12   :  { %1849 = vmatpush3.bf16.msra.mxu0 %v1848_v44  ;;  %1573 = vmatprep.mubr.msk.f32.mxu1 %vm2054_vm0, %v2055_v8  ;;  %v153_v2 = vsub.f32 %v2187_v55, %v152_v61  ;;  %v162_v5 = vand.u32 4294901760, %v2209_v63  ;;  %v1863_v32 = vpack.c.bf16 %v200_v19, %v193_v18  ;;  %v1866_v11 = vpack.c.bf16 %v214_v22, %v207_v20 }
  0x13   :  { %1850 = vmatprep.subr.bf16.mxu0 %v2053_v3  ;;  %1948 = vmatpush3.bf16.msra.mxu1 %v1845_v39  ;;  %v172_v21 = vand.u32 4294901760, %v2228_v9  ;;  %v181_v24 = vsub.f32 %v49_v4, %v2230_v10  ;;  %vm810_vm3 = vcmask 408576   ;;  %vm817_vm5 = vcmask 1041408  }
  0x14   :  { %1947 = vmatprep.subr.bf16.mxu1 %v2053_v3  ;;  %2028 = vset.pattern.permute.xlu0 %v2056_v6  ;;  %v154_v14 = vand.u32 4294901760, %v153_v2  ;;  %v163_v17 = vsub.f32 %v2209_v63, %v162_v5  ;;  %vm1414_vm6 = vcmask 1041409   ;;  %vm1417_vm7 = vcmask 254976  }
  0x15   :  { %1600 = vmatmul.mubr.f32.vlgmr.msra.gmra.mrb[0].mxu0 %v2141_v29  ;;  %1574 = vmatmul.mubr.f32.gmra.mrb[2].mxu1 %v134_v57  ;;  %v173_v26 = vsub.f32 %v2228_v9, %v172_v21  ;;  %v182_v27 = vand.u32 4294901760, %v181_v24 }
  0x16   :  { %1852 = vmatpush3.bf16.msra.mxu0 %v1851_v54  ;;  %1602 = vmatprep.mubr.msk.f32.mxu0 %vm2054_vm0, %v2055_v8  ;;  %v164_v25 = vand.u32 4294901760, %v163_v17 }
  0x17   :  { %1853 = vmatprep.subr.bf16.mxu0 %v2053_v3  ;;  %1576 = vmatprep.mubr.msk.f32.mxu1 %vm2054_vm0, %v2055_v8  ;;  %v174_v28 = vand.u32 4294901760, %v173_v26  ;;  %v183_v30 = vsub.f32 %v181_v24, %v182_v27 }
  0x18   :  { %1949 = vmatpush3.bf16.msra.mxu1 %v1848_v44  ;;  %799 = vperm.xlu0 %2028, %v794_v7  }
  0x19   :  { %1603 = vmatmul.mubr.f32.gmra.mrb[2].mxu0 %v2146_v34  ;;  %1577 = vmatmul.mubr.f32.gmra.mrb[4].mxu1 %v144_v1  ;;  %v184_v31 = vand.u32 4294901760, %v183_v30 }
  0x1a   :  { %1855 = vmatpush3.bf16.msra.mxu0 %v1854_v62  ;;  %1628 = vmatprep.mubr.msk.f32.mxu0 %vm2054_vm0, %v2055_v8 }
  0x1b   :  { %1856 = vmatprep.subr.bf16.mxu0 %v2053_v3  ;;  %1579 = vmatprep.mubr.msk.f32.mxu1 %vm2054_vm0, %v2055_v8 }
  0x1c   :  { %802 = vperm.xlu0 %2028, %v795_v23  }
  0x1d   :  { %1629 = vmatmul.mubr.f32.vlgmr.msra.gmra.mrb[0].mxu0 %v2149_v36  ;;  %1580 = vmatmul.mubr.f32.gmra.mrb[6].mxu1 %v154_v14 }
  0x1e   :  { %1631 = vmatprep.mubr.msk.f32.mxu0 %vm2054_vm0, %v2055_v8  ;;  %1858 = vmatpush3.bf16.msra.mxu0 %v2115_v16 }
  0x1f   :  { %1859 = vmatprep.subr.bf16.mxu0 %v2053_v3  ;;  %1582 = vmatprep.mubr.msk.f32.mxu1 %vm2054_vm0, %v2055_v8 }
  0x21   :  { %1632 = vmatmul.mubr.f32.gmra.mrb[2].mxu0 %v2156_v40  ;;  %1583 = vmatmul.mubr.f32.gmra.mrb[8].mxu1 %v164_v25 }
  0x22   :  { %1634 = vmatprep.mubr.msk.f32.mxu0 %vm2054_vm0, %v2055_v8  ;;  %1861 = vmatpush3.bf16.msra.mxu0 %v2153_v38 }
  0x23   :  { %1862 = vmatprep.subr.bf16.mxu0 %v2053_v3  ;;  %1585 = vmatprep.mubr.msk.f32.mxu1 %vm2054_vm0, %v2055_v8 }
  0x25   :  { %1635 = vmatmul.mubr.f32.gmra.mrb[4].mxu0 %v2168_v46  ;;  %1586 = vmatmul.mubr.f32.gmra.mrb[10].mxu1 %v174_v28 }
  0x26   :  { %1637 = vmatprep.mubr.msk.f32.mxu0 %vm2054_vm0, %v2055_v8  ;;  %1588 = vmatprep.mubr.msk.f32.mxu1 %vm2054_vm0, %v2055_v8 }
  0x29   :  { %1638 = vmatmul.mubr.f32.gmra.mrb[6].mxu0 %v2187_v55  ;;  %1589 = vmatmul.mubr.f32.gmra.mrb[12].mxu1 %v184_v31 }
  0x2a   :  { %1640 = vmatprep.mubr.msk.f32.mxu0 %vm2054_vm0, %v2055_v8  ;;  %1605 = vmatprep.mubr.msk.f32.mxu1 %vm2054_vm0, %v2055_v8 }
  0x2d   :  { %1641 = vmatmul.mubr.f32.gmra.mrb[8].mxu0 %v2209_v63  ;;  %1606 = vmatmul.mubr.f32.vlgmr.msra.gmra.mrb[4].mxu1 %v2151_v37 }
  0x2e   :  { %1643 = vmatprep.mubr.msk.f32.mxu0 %vm2054_vm0, %v2055_v8  ;;  %1608 = vmatprep.mubr.msk.f32.mxu1 %vm2054_vm0, %v2055_v8 }
  0x31   :  { %1644 = vmatmul.mubr.f32.gmra.mrb[10].mxu0 %v2228_v9  ;;  %1609 = vmatmul.mubr.f32.gmra.mrb[6].mxu1 %v2170_v47 }
  0x32   :  { %1646 = vmatprep.mubr.msk.f32.mxu0 %vm2054_vm0, %v2055_v8  ;;  %1611 = vmatprep.mubr.msk.f32.mxu1 %vm2054_vm0, %v2055_v8 }
  0x35   :  { %1647 = vmatmul.mubr.f32.gmra.mrb[12].mxu0 %v181_v24  ;;  %1612 = vmatmul.mubr.f32.gmra.mrb[8].mxu1 %v2189_v56 }
  0x36   :  { %1657 = vmatprep.mubr.msk.f32.mxu0 %vm2054_vm0, %v2055_v8  ;;  %1614 = vmatprep.mubr.msk.f32.mxu1 %vm2054_vm0, %v2055_v8 }
  0x39   :  { %1658 = vmatmul.mubr.f32.vlgmr.msra.gmra.mrb[0].mxu0 %v122_v43  ;;  %1615 = vmatmul.mubr.f32.gmra.mrb[10].mxu1 %v2211_v0 }
  0x3a   :  { %1660 = vmatprep.mubr.msk.f32.mxu0 %vm2054_vm0, %v2055_v8  ;;  %1864 = vmatpush3.bf16.msra.mxu0 %v1863_v32 }
  0x3b   :  { %1865 = vmatprep.subr.bf16.mxu0 %v2053_v3  ;;  %1617 = vmatprep.mubr.msk.f32.mxu1 %vm2054_vm0, %v2055_v8 }
  0x3d   :  { %1661 = vmatmul.mubr.f32.gmra.mrb[2].mxu0 %v132_v45  ;;  %1618 = vmatmul.mubr.f32.gmra.mrb[12].mxu1 %v2230_v10 }
  0x3e   :  { %1663 = vmatprep.mubr.msk.f32.mxu0 %vm2054_vm0, %v2055_v8  ;;  %1867 = vmatpush3.bf16.msra.mxu0 %v1866_v11 }
  0x3f   :  { %1868 = vmatprep.subr.bf16.mxu0 %v2053_v3 }
  0x41   :  { %1664 = vmatmul.mubr.f32.gmra.mrb[4].mxu0 %v142_v52 }
  0x42   :  { %1666 = vmatprep.mubr.msk.f32.mxu0 %vm2054_vm0, %v2055_v8 }
  0x45   :  { %1667 = vmatmul.mubr.f32.gmra.mrb[6].mxu0 %v152_v61 }
  0x46   :  { %1669 = vmatprep.mubr.msk.f32.mxu0 %vm2054_vm0, %v2055_v8 }
  0x49   :  { %1670 = vmatmul.mubr.f32.gmra.mrb[8].mxu0 %v162_v5 }
  0x4a   :  { %1672 = vmatprep.mubr.msk.f32.mxu0 %vm2054_vm0, %v2055_v8 }
  0x4d   :  { %1673 = vmatmul.mubr.f32.gmra.mrb[10].mxu0 %v172_v21 }
  0x4e   :  { %1675 = vmatprep.mubr.msk.f32.mxu0 %vm2054_vm0, %v2055_v8 }
  0x51   :  { %1676 = vmatmul.mubr.f32.gmra.mrb[12].mxu0 %v182_v27 }
  0x52   :  { %1686 = vmatprep.mubr.msk.f32.mxu0 %vm2054_vm0, %v2055_v8 }
  0x55   :  { %1687 = vmatmul.mubr.f32.vlgmr.msra.gmra.mrb[0].mxu0 %v2141_v29 }
  0x56   :  { %1689 = vmatprep.mubr.msk.f32.mxu0 %vm2054_vm0, %v2055_v8  ;;  %1870 = vmatpush3.bf16.msra.mxu0 %v2115_v16 }
  0x57   :  { %1871 = vmatprep.subr.bf16.mxu0 %v2053_v3  ;;  %v796_v3 = vlaneseq }
  0x59   :  { %1690 = vmatmul.mubr.f32.gmra.mrb[2].mxu0 %v2146_v34  ;;  %v797_v12 = vand.u32 127, %v796_v3 }
  0x5a   :  { %1692 = vmatprep.mubr.msk.f32.mxu0 %vm2054_vm0, %v2055_v8  ;;  %1873 = vmatpush3.bf16.msra.mxu0 %v2153_v38 }
  0x5d   :  { %1693 = vmatmul.mubr.f32.gmra.mrb[4].mxu0 %v2151_v37 }
  0x5e   :  { %1695 = vmatprep.mubr.msk.f32.mxu0 %vm2054_vm0, %v2055_v8 }
  0x61   :  { %1696 = vmatmul.mubr.f32.gmra.mrb[6].mxu0 %v2170_v47 }
  0x62   :  { %1698 = vmatprep.mubr.msk.f32.mxu0 %vm2054_vm0, %v2055_v8 }
  0x65   :  { %1699 = vmatmul.mubr.f32.gmra.mrb[8].mxu0 %v2189_v56 }
  0x66   :  { %1701 = vmatprep.mubr.msk.f32.mxu0 %vm2054_vm0, %v2055_v8 }
  0x69   :  { %1702 = vmatmul.mubr.f32.gmra.mrb[10].mxu0 %v2211_v0 }
  0x6a   :  { %1704 = vmatprep.mubr.msk.f32.mxu0 %vm2054_vm0, %v2055_v8 }
  0x6d   :  { %1705 = vmatmul.mubr.f32.gmra.mrb[12].mxu0 %v2230_v10 }
  0x6e   :  { %1715 = vmatprep.mubr.msk.f32.mxu0 %vm2054_vm0, %v2055_v8 }
  0x71   :  { %1716 = vmatmul.mubr.f32.vlgmr.msra.gmra.mrb[0].mxu0 %v2141_v29 }
  0x72   :  { %1718 = vmatprep.mubr.msk.f32.mxu0 %vm2054_vm0, %v2055_v8 }
  0x75   :  { %1719 = vmatmul.mubr.f32.gmra.mrb[2].mxu0 %v2146_v34 }
  0x76   :  { %1721 = vmatprep.mubr.msk.f32.mxu0 %vm2054_vm0, %v2055_v8 }
  0x79   :  { %1722 = vmatmul.mubr.f32.gmra.mrb[4].mxu0 %v2151_v37 }
  0x7a   :  { %1724 = vmatprep.mubr.msk.f32.mxu0 %vm2054_vm0, %v2055_v8 }
  0x7d   :  { %1725 = vmatmul.mubr.f32.gmra.mrb[6].mxu0 %v2170_v47 }
  0x7e   :  { %1727 = vmatprep.mubr.msk.f32.mxu0 %vm2054_vm0, %v2055_v8 }
  0x81   :  { %1728 = vmatmul.mubr.f32.gmra.mrb[8].mxu0 %v2189_v56 }
  0x82   :  { %1730 = vmatprep.mubr.msk.f32.mxu0 %vm2054_vm0, %v2055_v8 }
  0x85   :  { %1731 = vmatmul.mubr.f32.gmra.mrb[10].mxu0 %v2211_v0 }
  0x86   :  { %1733 = vmatprep.mubr.msk.f32.mxu0 %vm2054_vm0, %v2055_v8 }
  0x89   :  { %1734 = vmatmul.mubr.f32.gmra.mrb[12].mxu0 %v2230_v10 }
  0x97   :  { %v800_v13 = vpop.permute.xlu0 %799 }
  0x98   :  { %vm804_vm2 = vcmp.eq.s32.totalorder %v797_v12, %v800_v13 }
  0x99   :  { %v2366_v15 = vsel %vm804_vm2, 1.0, %v2055_v8 }
  0x9a   :  { %v812_v16 = vsel %vm810_vm3, %v2366_v15, 0 }
  0x9b   :  { %v2370_v18 = vsub.f32 %v812_v16, %v812_v16  ;;  %v803_v51 = vpop.permute.xlu0 %802 }
  0x9c   :  { %vm805_vm4 = vcmp.eq.s32.totalorder %v797_v12, %v803_v51 }
  0x9d   :  { %v895_v19 = vand.u32 4294901760, %v2370_v18  ;;  %v2381_v62 = vsel %vm805_vm4, 1.0, %v2055_v8 }
  0x9e   :  { %v815_v8 = vsel %vm810_vm3, %v2381_v62, 0 }
  0x9f   :  { %v896_v20 = vsub.f32 %v2370_v18, %v895_v19  ;;  %v2393_v31 = vsub.f32 %v815_v8, %v815_v8 }
  0xa1   :  { %v897_v22 = vand.u32 4294901760, %v896_v20 }
  0xa3   :  { %1750 = vmatprep.mubr.f32.mxu1 %v897_v22 }
  0xe4   :  { %v126_v29 = vpop.f32.mrb[0].mxu1 }
  0xe5   :  { %v1572_v33 = vpop.f32.mrb[1].mxu1 }
  0xe8   :  { %v136_v34 = vpop.f32.mrb[2].mxu1 }
  0xe9   :  { %v1575_v35 = vpop.f32.mrb[3].mxu1 }
 0x100   :  { %v289_v36 = vpop.f32.mrb[4].mxu1 }
 0x101   :  { %v1607_v37 = vpop.f32.mrb[5].mxu1 }
 0x104   :  { %v295_v38 = vpop.f32.mrb[6].mxu1 }
 0x105   :  { %v1610_v39 = vpop.f32.mrb[7].mxu1 }
 0x108   :  { %v301_v40 = vpop.f32.mrb[8].mxu1 }
 0x109   :  { %v1613_v41 = vpop.f32.mrb[9].mxu1 }
 0x10c   :  { %v307_v42 = vpop.f32.mrb[10].mxu1 }
 0x10d   :  { %v1616_v43 = vpop.f32.mrb[11].mxu1 }
 0x110   :  { %v2376_v44 = vpop.f32.mrb[12].mxu1 }
 0x111   :  { %v1619_v45 = vpop.f32.mrb[13].mxu1 }
 0x144   :  { %v754_v46 = vpop.f32.mrb[0].mxu0 }
 0x145   :  { %v1950_v47 = vadd.f32 %v754_v46, %v126_v29  ;;  %v1717_v48 = vpop.f32.mrb[1].mxu0 }
 0x147   :  { %v822_v49 = vand.u32 4294901760, %v1950_v47 }
 0x148   :  { %v760_v50 = vpop.f32.mrb[2].mxu0 }
 0x149   :  { %v915_v52 = vsub.f32 %v1950_v47, %v822_v49  ;;  %v1951_v53 = vadd.f32 %v760_v50, %v136_v34  ;;  %v1720_v54 = vpop.f32.mrb[3].mxu0  ;;  %v905_v34 = vand.u32 4294901760, %v2393_v31 }
 0x14b   :  { %v916_v55 = vand.u32 4294901760, %v915_v52  ;;  %v825_v56 = vand.u32 4294901760, %v1951_v53 }
 0x14c   :  { %v766_v57 = vpop.f32.mrb[4].mxu0 }
 0x14d   :  { %v2378_v58 = vpack.c.bf16 %v825_v56, %v822_v49  ;;  %v922_v59 = vsub.f32 %v1951_v53, %v825_v56  ;;  %v1952_v60 = vadd.f32 %v766_v57, %v289_v36  ;;  %v1723_v61 = vpop.f32.mrb[5].mxu0  ;;  %v917_v1 = vsub.f32 %v915_v52, %v916_v55 }
 0x14f   :  { %v923_v63 = vand.u32 4294901760, %v922_v59  ;;  %v828_v0 = vand.u32 4294901760, %v1952_v60  ;;  %1875 = vmatprep.subr.bf16.mxu1 %v2378_v58  ;;  %v2384_v2 = vpack.c.bf16 %v922_v59, %v915_v52  ;;  %v918_v21 = vand.u32 4294901760, %v917_v1 }
 0x150   :  { %v772_v4 = vpop.f32.mrb[6].mxu0  ;;  %1877 = vmatpush3.bf16.msra.mxu1 %v2378_v58 }
 0x151   :  { %v929_v5 = vsub.f32 %v1952_v60, %v828_v0  ;;  %v1953_v6 = vadd.f32 %v772_v4, %v295_v38  ;;  %v1726_v7 = vpop.f32.mrb[7].mxu0  ;;  %v924_v9 = vsub.f32 %v922_v59, %v923_v63  ;;  %v2387_v10 = vpack.c.bf16 %v923_v63, %v916_v55 }
 0x153   :  { %v930_v14 = vand.u32 4294901760, %v929_v5  ;;  %v831_v17 = vand.u32 4294901760, %v1953_v6  ;;  %v925_v23 = vand.u32 4294901760, %v924_v9 }
 0x154   :  { %v778_v24 = vpop.f32.mrb[8].mxu0 }
 0x155   :  { %v2391_v25 = vpack.c.bf16 %v831_v17, %v828_v0  ;;  %v936_v26 = vsub.f32 %v1953_v6, %v831_v17  ;;  %v1954_v27 = vadd.f32 %v778_v24, %v301_v40  ;;  %v1729_v28 = vpop.f32.mrb[9].mxu0  ;;  %v1886_v30 = vpack.c.bf16 %v925_v23, %v918_v21 }
 0x156   :  { %v931_v3 = vsub.f32 %v929_v5, %v930_v14 }
 0x157   :  { %v937_v32 = vand.u32 4294901760, %v936_v26  ;;  %v834_v11 = vand.u32 4294901760, %v1954_v27  ;;  %1879 = vmatprep.subr.bf16.mxu1 %v2391_v25  ;;  %v1902_v12 = vpack.c.bf16 %v936_v26, %v929_v5 }
 0x158   :  { %v784_v13 = vpop.f32.mrb[10].mxu0  ;;  %1881 = vmatpush3.bf16.msra.mxu1 %v2391_v25  ;;  %v932_v37 = vand.u32 4294901760, %v931_v3 }
 0x159   :  { %v943_v16 = vsub.f32 %v1954_v27, %v834_v11  ;;  %v1955_v20 = vadd.f32 %v784_v13, %v307_v42  ;;  %v1732_v22 = vpop.f32.mrb[11].mxu0  ;;  %v938_v29 = vsub.f32 %v936_v26, %v937_v32  ;;  %v2397_v33 = vpack.c.bf16 %v937_v32, %v930_v14 }
 0x15a   :  { %v906_v42 = vsub.f32 %v2393_v31, %v905_v34 }
 0x15b   :  { %v944_v35 = vand.u32 4294901760, %v943_v16  ;;  %v837_v36 = vand.u32 4294901760, %v1955_v20  ;;  %v939_v38 = vand.u32 4294901760, %v938_v29 }
 0x15c   :  { %v790_v39 = vpop.f32.mrb[12].mxu0  ;;  %v907_v55 = vand.u32 4294901760, %v906_v42 }
 0x15d   :  { %v2400_v40 = vpack.c.bf16 %v837_v36, %v834_v11  ;;  %v950_v41 = vsub.f32 %v1955_v20, %v837_v36  ;;  %v1956_v43 = vadd.f32 %v790_v39, %v2376_v44  ;;  %v1735_v45 = vpop.f32.mrb[13].mxu0  ;;  %v1890_v46 = vpack.c.bf16 %v939_v38, %v932_v37 }
 0x15e   :  { %v945_v49 = vsub.f32 %v943_v16, %v944_v35 }
 0x15f   :  { %v951_v47 = vand.u32 4294901760, %v950_v41  ;;  %v819_v48 = vsel %vm817_vm5, %v1956_v43, 0  ;;  %1883 = vmatprep.subr.bf16.mxu1 %v2400_v40  ;;  %v1906_v50 = vpack.c.bf16 %v950_v41, %v943_v16 }
 0x160   :  { %v840_v51 = vand.u32 4294901760, %v819_v48  ;;  %1885 = vmatpush3.bf16.msra.mxu1 %v2400_v40  ;;  %v946_v56 = vand.u32 4294901760, %v945_v49 }
 0x161   :  { %v952_v52 = vsub.f32 %v950_v41, %v951_v47  ;;  %v1930_v53 = vpack.c.bf16 %v951_v47, %v944_v35 }
 0x162   :  { %v957_v54 = vsub.f32 %v819_v48, %v840_v51  ;;  %1748 = vmatprep.subr.mxu1 %v840_v51 }
 0x163   :  { %v953_v44 = vand.u32 4294901760, %v952_v52 }
 0x164   :  { %1749 = vmatpush3.msra.mxu1 %v840_v51  ;;  %v958_v59 = vand.u32 4294901760, %v957_v54 }
 0x165   :  { %1751 = vmatmul.mubr.f32.vlgmr.msra.gmra.mrb[14].mxu1 %v907_v55  ;;  %1887 = vmatprep.subr.bf16.mxu1 %v1886_v30  ;;  %v1894_v57 = vpack.c.bf16 %v953_v44, %v946_v56 }
 0x166   :  { %1889 = vmatpush3.bf16.msra.mxu1 %v1886_v30  ;;  %1767 = vmatprep.mubr.msk.f32.mxu1 %vm810_vm3, %v2366_v15  ;;  %v959_v60 = vsub.f32 %v957_v54, %v958_v59 }
 0x167   :  { %1891 = vmatprep.subr.bf16.mxu1 %v1890_v46 }
 0x168   :  { %v960_v61 = vand.u32 4294901760, %v959_v60 }
 0x16a   :  { %1893 = vmatpush3.bf16.msra.mxu1 %v1890_v46 }
 0x16b   :  { %1895 = vmatprep.subr.bf16.mxu1 %v1894_v57 }
 0x16e   :  { %1897 = vmatpush3.bf16.msra.mxu1 %v1894_v57 }
 0x16f   :  { %1765 = vmatprep.subr.mxu1 %v960_v61 }
 0x172   :  { %1766 = vmatpush3.msra.mxu1 %v960_v61 }
 0x173   :  { %1768 = vmatmul.mubr.msk.f32.vlgmr.msra.gmra.mrb[14].mxu1 %vm810_vm3, %v2381_v62  ;;  %1899 = vmatprep.subr.bf16.mxu1 %v2384_v2 }
 0x174   :  { %1901 = vmatpush3.bf16.msra.mxu1 %v2384_v2  ;;  %1784 = vmatprep.mubr.f32.mxu1 %v2370_v18 }
 0x175   :  { %1903 = vmatprep.subr.bf16.mxu1 %v1902_v12 }
 0x178   :  { %1905 = vmatpush3.bf16.msra.mxu1 %v1902_v12 }
 0x179   :  { %1907 = vmatprep.subr.bf16.mxu1 %v1906_v50 }
 0x17c   :  { %1909 = vmatpush3.bf16.msra.mxu1 %v1906_v50 }
 0x17d   :  { %1782 = vmatprep.subr.mxu1 %v957_v54 }
 0x180   :  { %1783 = vmatpush3.msra.mxu1 %v957_v54 }
 0x181   :  { %1785 = vmatmul.mubr.f32.vlgmr.msra.gmra.mrb[14].mxu1 %v2393_v31  ;;  %1911 = vmatprep.subr.bf16.mxu1 %v2378_v58 }
 0x182   :  { %1913 = vmatpush3.bf16.msra.mxu1 %v2378_v58  ;;  %1801 = vmatprep.mubr.f32.mxu1 %v895_v19 }
 0x183   :  { %1915 = vmatprep.subr.bf16.mxu1 %v2391_v25 }
 0x186   :  { %1917 = vmatpush3.bf16.msra.mxu1 %v2391_v25 }
 0x187   :  { %1919 = vmatprep.subr.bf16.mxu1 %v2400_v40 }
 0x18a   :  { %1921 = vmatpush3.bf16.msra.mxu1 %v2400_v40 }
 0x18b   :  { %1799 = vmatprep.subr.mxu1 %v840_v51 }
 0x18e   :  { %1800 = vmatpush3.msra.mxu1 %v840_v51 }
 0x18f   :  { %1802 = vmatmul.mubr.f32.vlgmr.msra.gmra.mrb[14].mxu1 %v905_v34  ;;  %1923 = vmatprep.subr.bf16.mxu1 %v2387_v10 }
 0x190   :  { %1925 = vmatpush3.bf16.msra.mxu1 %v2387_v10  ;;  %1818 = vmatprep.mubr.msk.f32.mxu1 %vm810_vm3, %v2366_v15  ;;  %v1441_v10 = vld [vmem:[%s2460_s3] ss:$0 sm:$0xff] }
 0x191   :  { %1927 = vmatprep.subr.bf16.mxu1 %v2397_v33 }
 0x194   :  { %1929 = vmatpush3.bf16.msra.mxu1 %v2397_v33 }
 0x195   :  { %1931 = vmatprep.subr.bf16.mxu1 %v1930_v53 }
 0x198   :  { %1933 = vmatpush3.bf16.msra.mxu1 %v1930_v53 }
 0x199   :  { %1816 = vmatprep.subr.mxu1 %v958_v59 }
 0x19c   :  { %1817 = vmatpush3.msra.mxu1 %v958_v59 }
 0x19d   :  { %1819 = vmatmul.mubr.msk.f32.vlgmr.msra.gmra.mrb[14].mxu1 %vm810_vm3, %v2381_v62  ;;  %1935 = vmatprep.subr.bf16.mxu1 %v2378_v58 }
 0x19e   :  { %1937 = vmatpush3.bf16.msra.mxu1 %v2378_v58  ;;  %1835 = vmatprep.mubr.msk.f32.mxu1 %vm810_vm3, %v2366_v15 }
 0x19f   :  { %1939 = vmatprep.subr.bf16.mxu1 %v2391_v25 }
 0x1a2   :  { %1941 = vmatpush3.bf16.msra.mxu1 %v2391_v25 }
 0x1a3   :  { %1943 = vmatprep.subr.bf16.mxu1 %v2400_v40 }
 0x1a6   :  { %1945 = vmatpush3.bf16.msra.mxu1 %v2400_v40 }
 0x1a7   :  { %1833 = vmatprep.subr.mxu1 %v840_v51 }
 0x1aa   :  { %1834 = vmatpush3.msra.mxu1 %v840_v51 }
 0x1ab   :  { %1836 = vmatmul.mubr.msk.f32.vlgmr.msra.gmra.mrb[14].mxu1 %vm810_vm3, %v2381_v62 }
 0x27e   :  { %v1837_v18 = vpop.f32.mrb[14].mxu1 }
 0x27f   :  { %v1395_v19 = vsel %vm29_vm1, %v1837_v18, -inf  ;;  %v1378_v58 = vpop.f32.mrb[15].mxu1 }
 0x280   :  { %v1396_v63 = vrot.slane %v1395_v19, 4  ;;  %v1388_v15 = vsel %vm29_vm1, %v1378_v58, -inf }
 0x281   :  { %v1389_v0 = vrot.slane %v1388_v15, 4 }
 0x282   :  { %v1397_v1 = vmax.f32 %v1395_v19, %v1396_v63 }
 0x283   :  { %v1390_v2 = vmax.f32 %v1388_v15, %v1389_v0 }
 0x284   :  { %v1398_v4 = vrot.slane %v1397_v1, 2 }
 0x285   :  { %v1391_v5 = vrot.slane %v1390_v2, 2 }
 0x286   :  { %v1399_v6 = vmax.f32 %v1397_v1, %v1398_v4 }
 0x287   :  { %v1392_v7 = vmax.f32 %v1390_v2, %v1391_v5 }
 0x288   :  { %v1400_v9 = vrot.slane %v1399_v6, 1 }
 0x289   :  { %v1393_v62 = vrot.slane %v1392_v7, 1 }
 0x28a   :  { %v1401_v8 = vmax.f32 %v1399_v6, %v1400_v9 }
 0x28b   :  { %v1394_v14 = vmax.f32 %v1392_v7, %v1393_v62 }
 0x28c   :  { %v1410_v17 = vadd.f32 %v1441_v10, %v1401_v8 }
 0x28d   :  { %v1409_v21 = vadd.f32 %v1441_v10, %v1394_v14 }
 0x28e   :  { %v1413_v23 = vrot.slane %v1410_v17, 7 }
 0x290   :  { %v1415_v24 = vsel %vm1414_vm6, %v1413_v23, %v1409_v21 }
 0x291   :  { %1418 = vst.msk [vmem:[#allocation2] sm:$0x3] %vm1417_vm7, %v1415_v24 }
 0x292   :  { %2040 = shalt.err (!%p2037_p4)
}
 0x293   :  { %s2041_s18 = scalar_lea.hbm %s2461_s4, 32 }
 0x294   :  { %p2042_p5 = scmp.ne.s32.totalorder %s2461_s4, %s2041_s18  ;;  %p2045_p6 = scmp.lt.u32.totalorder %s2041_s18, %s2461_s4 }
 0x296   :  { %p2047_p7 = pnand %p2045_p6, %p2042_p5 }
 0x298   :  { %2050 = shalt.err (!%p2047_p7)
}
 0x299   :  { %1428 = dma.vmem_to_hbm [thread:$0]  %s1426_s15, 32, %s2461_s4, [#allocation3]  }
 0x29a   :  { %2051 = dma.done.wait [#allocation3], 32  }
 0x29b   :  { %2052 = vsyncadd [#allocation3], 4294967264 }
 0x29c   :  { %1432 = vsyncpa [#allocation3], 1 }

</bundles_post_ra>
